<compile_context>
chip_gen: v5e
topology: v5e:2x2
jax: 0.10.0
libtpu: 0.0.40
codegen_flags: <defaults>
</compile_context>

<pallas_src>
import jax
import jax.numpy as jnp
from jax.experimental import pallas as pl
from jax.experimental.pallas import tpu as pltpu

D = 300          # embedding_length used by distMtx_core_module / prot_transform output
NUM_CLASS = 2    # pred_mode='binary'


def dti_distmtx_kernel(selp_ref, protfull_ref, wt_ref, bt_ref,
                       selc_ref, chemfull_ref, u_ref, wf_ref, bf_ref,
                       out_ref):
    Bb, Np, _ = selp_ref.shape
    Nc = selc_ref.shape[1]
    dim = protfull_ref.shape[2]
    d_emb = wt_ref.shape[1]                                   # == D

    # --- binding-site selection (per-batch bmm, tiny) -------------------------
    bs_prot = jnp.einsum('bnl,bld->bnd', selp_ref[...], protfull_ref[...],
                         preferred_element_type=jnp.float32)   # (Bb, Np, dim)
    A3 = jnp.einsum('bml,bld->bmd', selc_ref[...], chemfull_ref[...],
                    preferred_element_type=jnp.float32)        # (Bb, Nc, D)

    # --- prot_transform + Q @ U, flattened so the MXU sees M = Bb*Np ----------
    q_flat = jnp.dot(bs_prot.reshape(Bb * Np, dim), wt_ref[...],
                     preferred_element_type=jnp.float32) + bt_ref[...]   # (Bb*Np, D)
    qu_flat = jnp.dot(q_flat, u_ref[...],
                      preferred_element_type=jnp.float32)                # (Bb*Np, D)
    Q3 = q_flat.reshape(Bb, Np, d_emb)
    QU3 = qu_flat.reshape(Bb, Np, d_emb)

    # --- AttentivePooling2: G = tanh(Q @ U @ A^T), per batch ------------------
    G = jnp.tanh(jnp.einsum('bnd,bmd->bnm', QU3, A3,
                            preferred_element_type=jnp.float32))         # (Bb, Np, Nc)

    g_q = jnp.max(G, axis=2)                                             # (Bb, Np)
    g_a = jnp.max(G, axis=1)                                             # (Bb, Nc)

    def masked_softmax(g):
        # inherited from the PyTorch source: mask exact zeros before softmax
        g = jnp.where(g == 0.0, jnp.float32(-1e9), g)
        m = jnp.max(g, axis=-1, keepdims=True)
        e = jnp.exp(g - m)
        return e / jnp.sum(e, axis=-1, keepdims=True)

    sigma_q = masked_softmax(g_q)                                        # (Bb, Np)
    sigma_a = masked_softmax(g_a)                                        # (Bb, Nc)

    # --- attention-weighted representations (VPU: broadcast-mul + reduce) ----
    prot_vec = jnp.sum(sigma_q[:, :, None] * Q3, axis=1)                 # (Bb, D)
    chem_vec = jnp.sum(sigma_a[:, :, None] * A3, axis=1)                 # (Bb, D)

    # --- reassociated pairwise feature + ffn ----------------------------------
    # TODO(synk): the PyTorch source indexes a_vec[:, :, None, :] on a 2-D
    # tensor (IndexError as written); implemented as the outer product
    # feat[b, i, j] = prot_vec[b, i] * chem_vec[b, j].
    # feat @ Wf + bf is reassociated as prot_vec ⊗ (chem_vec @ Wf) + bf, so the
    # D x D intermediate is never materialized.  Output emitted transposed
    # (Bb, C, D) so D=300 sits on the lane axis (lane-dense stores).
    v = jnp.dot(chem_vec, wf_ref[...],
                preferred_element_type=jnp.float32)                      # (Bb, C)
    out_ref[...] = (v[:, :, None] * prot_vec[:, None, :]
                    + bf_ref[...][:, :, None])                           # (Bb, C, D)


def _pick_block_batch(B, target=16):
    """Largest divisor of B not exceeding `target` (batch elems per grid step)."""
    bb = 1
    for d in range(1, min(B, target) + 1):
        if B % d == 0:
            bb = d
    return bb


def dti_distmtx_forward(sel_prot, embed_full_prot, Wt, bt,
                        sel_chem, graph_repr, U, Wf, bf):
    B, Np, Lp = sel_prot.shape
    dim = embed_full_prot.shape[2]
    _, Nc, Lc = sel_chem.shape
    C = Wf.shape[1]
    bt2 = bt.reshape(1, D)
    bf2 = bf.reshape(1, C)

    Bb = _pick_block_batch(B)          # e.g. 16 for large B, 2 for the demo
    grid = (B // Bb,)

    out_t = pl.pallas_call(
        dti_distmtx_kernel,
        out_shape=jax.ShapeDtypeStruct((B, C, D), jnp.float32),   # lane-dense (C, D)
        grid=grid,
        in_specs=[
            pl.BlockSpec((Bb, Np, Lp), lambda b: (b, 0, 0)),      # sel_prot
            pl.BlockSpec((Bb, Lp, dim), lambda b: (b, 0, 0)),     # embed_full_prot
            pl.BlockSpec((dim, D), lambda b: (0, 0)),             # prot_transform W
            pl.BlockSpec((1, D), lambda b: (0, 0)),               # prot_transform b
            pl.BlockSpec((Bb, Nc, Lc), lambda b: (b, 0, 0)),      # sel_chem
            pl.BlockSpec((Bb, Lc, D), lambda b: (b, 0, 0)),       # dense chem graph repr
            pl.BlockSpec((D, D), lambda b: (0, 0)),               # U (attentive pooling)
            pl.BlockSpec((D, C), lambda b: (0, 0)),               # ffn W
            pl.BlockSpec((1, C), lambda b: (0, 0)),               # ffn b
        ],
        out_specs=pl.BlockSpec((Bb, C, D), lambda b: (b, 0, 0)),
        compiler_params=pltpu.CompilerParams(
            dimension_semantics=("parallel",)),                   # independent batch axis
    )(sel_prot, embed_full_prot, Wt, bt2, sel_chem, graph_repr, U, Wf, bf2)

    # back to the module's (B, D, C) logits layout
    return jnp.transpose(out_t, (0, 2, 1))


def reference_forward(sel_prot, embed_full_prot, Wt, bt,
                      sel_chem, graph_repr, U, Wf, bf):
    """Pure-JAX reference of the same math (for a correctness check)."""
    Q = jnp.einsum('bnl,bld->bnd', sel_prot, embed_full_prot) @ Wt + bt
    A = jnp.einsum('bnl,bld->bnd', sel_chem, graph_repr)
    G = jnp.tanh(jnp.einsum('bnd,de,bme->bnm', Q, U, A))
    g_q = G.max(axis=2)
    g_a = G.max(axis=1)

    def attn(g, X):
        g = jnp.where(g == 0.0, -1e9, g)
        s = jax.nn.softmax(g, axis=-1)
        return jnp.einsum('bn,bnd->bd', s, X)

    pv = attn(g_q, Q)
    cv = attn(g_a, A)
    feat = pv[:, :, None] * cv[:, None, :]
    return feat @ Wf + bf


if __name__ == "__main__":
    key = jax.random.PRNGKey(0)
    ks = jax.random.split(key, 9)

    B, Lp, Np, dim = 2, 16, 8, 20      # protein: full length, binding-site residues
    Lc, Nc = 12, 6                     # chem: atoms, binding-site atoms
    C = NUM_CLASS

    sel_prot = jax.random.uniform(ks[0], (B, Np, Lp), jnp.float32)
    embed_full_prot = jax.random.normal(ks[1], (B, Lp, dim), jnp.float32)
    sel_chem = jax.random.uniform(ks[2], (B, Nc, Lc), jnp.float32)
    graph_repr = jax.random.normal(ks[3], (B, Lc, D), jnp.float32)

    # Parameters (deterministic; NOTE: U is torch.zeros in __init__, a random
    # init is used here so the attention path is exercised non-trivially).
    Wt = 0.1 * jax.random.normal(ks[4], (dim, D), jnp.float32)   # prot_transform
    bt = 0.1 * jax.random.normal(ks[5], (D,), jnp.float32)
    U = 0.05 * jax.random.normal(ks[6], (D, D), jnp.float32)     # AttentivePooling2.U
    Wf = 0.1 * jax.random.normal(ks[7], (D, C), jnp.float32)     # ffn
    bf = 0.1 * jax.random.normal(ks[8], (C,), jnp.float32)

    out = dti_distmtx_forward(sel_prot, embed_full_prot, Wt, bt,
                              sel_chem, graph_repr, U, Wf, bf)
    out = jax.block_until_ready(out)

    ref = reference_forward(sel_prot, embed_full_prot, Wt, bt,
                            sel_chem, graph_repr, U, Wf, bf)
    assert out.shape == (B, D, C)
    assert jnp.allclose(out, ref, rtol=1e-4, atol=1e-4), "mismatch vs reference"

    print("KERNEL_OK")
</pallas_src>

<mosaic_0001>
module attributes {stable_mosaic.version = 11 : i64} {
  func.func @dti_distmtx_kernel(%arg0: i32, %arg1: memref<2x8x16xf32, #tpu.memory_space<vmem>>, %arg2: memref<2x16x20xf32, #tpu.memory_space<vmem>>, %arg3: memref<20x300xf32, #tpu.memory_space<vmem>>, %arg4: memref<1x300xf32, #tpu.memory_space<vmem>>, %arg5: memref<2x6x12xf32, #tpu.memory_space<vmem>>, %arg6: memref<2x12x300xf32, #tpu.memory_space<vmem>>, %arg7: memref<300x300xf32, #tpu.memory_space<vmem>>, %arg8: memref<300x2xf32, #tpu.memory_space<vmem>>, %arg9: memref<1x2xf32, #tpu.memory_space<vmem>>, %arg10: memref<2x2x300xf32, #tpu.memory_space<vmem>>) attributes {dimension_semantics = [#tpu.dimension_semantics<parallel>], iteration_bounds = array<i64: 1>, scalar_prefetch = 0 : i64, scratch_operands = 0 : i64, tpu.core_type = #tpu.core_type<tc>, window_params = [{transform_indices = @transform_0, window_bounds = array<i64: 2, 8, 16>}, {transform_indices = @transform_1, window_bounds = array<i64: 2, 16, 20>}, {pipeline_mode = #tpu.pipeline_mode<synchronous>, transform_indices = @transform_2, window_bounds = array<i64: 20, 300>}, {pipeline_mode = #tpu.pipeline_mode<synchronous>, transform_indices = @transform_3, window_bounds = array<i64: 1, 300>}, {transform_indices = @transform_4, window_bounds = array<i64: 2, 6, 12>}, {transform_indices = @transform_5, window_bounds = array<i64: 2, 12, 300>}, {pipeline_mode = #tpu.pipeline_mode<synchronous>, transform_indices = @transform_6, window_bounds = array<i64: 300, 300>}, {pipeline_mode = #tpu.pipeline_mode<synchronous>, transform_indices = @transform_7, window_bounds = array<i64: 300, 2>}, {pipeline_mode = #tpu.pipeline_mode<synchronous>, transform_indices = @transform_8, window_bounds = array<i64: 1, 2>}, {transform_indices = @transform_9, window_bounds = array<i64: 2, 2, 300>}]} {
    %c0 = arith.constant 0 : index
    %c0_0 = arith.constant 0 : index
    %c0_1 = arith.constant 0 : index
    %0 = vector.load %arg1[%c0, %c0_0, %c0_1] : memref<2x8x16xf32, #tpu.memory_space<vmem>>, vector<2x8x16xf32>
    %c0_2 = arith.constant 0 : index
    %c0_3 = arith.constant 0 : index
    %c0_4 = arith.constant 0 : index
    %1 = vector.load %arg2[%c0_2, %c0_3, %c0_4] : memref<2x16x20xf32, #tpu.memory_space<vmem>>, vector<2x16x20xf32>
    "tpu.trace_start"() <{level = 10 : i32, message = "bnl,bld->bnd"}> : () -> ()
    %cst = arith.constant dense<0.000000e+00> : vector<2x8x20xf32>
    %2 = tpu.matmul %0, %1, %cst {dimension_numbers = #tpu.dot_dimension_numbers<[2], [1], [1], [2], [0, 0, 0, 1, 1, 2], [0], [0]>} : vector<2x8x16xf32>, vector<2x16x20xf32>, vector<2x8x20xf32> -> vector<2x8x20xf32>
    "tpu.trace_stop"() : () -> ()
    %c0_5 = arith.constant 0 : index
    %c0_6 = arith.constant 0 : index
    %c0_7 = arith.constant 0 : index
    %3 = vector.load %arg5[%c0_5, %c0_6, %c0_7] : memref<2x6x12xf32, #tpu.memory_space<vmem>>, vector<2x6x12xf32>
    %c0_8 = arith.constant 0 : index
    %c0_9 = arith.constant 0 : index
    %c0_10 = arith.constant 0 : index
    %4 = vector.load %arg6[%c0_8, %c0_9, %c0_10] : memref<2x12x300xf32, #tpu.memory_space<vmem>>, vector<2x12x300xf32>
    "tpu.trace_start"() <{level = 10 : i32, message = "bml,bld->bmd"}> : () -> ()
    %cst_11 = arith.constant dense<0.000000e+00> : vector<2x6x300xf32>
    %5 = tpu.matmul %3, %4, %cst_11 {dimension_numbers = #tpu.dot_dimension_numbers<[2], [1], [1], [2], [0, 0, 0, 1, 1, 2], [0], [0]>} : vector<2x6x12xf32>, vector<2x12x300xf32>, vector<2x6x300xf32> -> vector<2x6x300xf32>
    "tpu.trace_stop"() : () -> ()
    %6 = vector.shape_cast %2 : vector<2x8x20xf32> to vector<16x20xf32>
    %c0_12 = arith.constant 0 : index
    %c0_13 = arith.constant 0 : index
    %7 = vector.load %arg3[%c0_12, %c0_13] : memref<20x300xf32, #tpu.memory_space<vmem>>, vector<20x300xf32>
    %cst_14 = arith.constant dense<0.000000e+00> : vector<16x300xf32>
    %8 = tpu.matmul %6, %7, %cst_14 {dimension_numbers = #tpu.dot_dimension_numbers<[1], [0], [0], [1], [0, 0, 1, 1], [], []>} : vector<16x20xf32>, vector<20x300xf32>, vector<16x300xf32> -> vector<16x300xf32>
    %c0_15 = arith.constant 0 : index
    %c0_16 = arith.constant 0 : index
    %9 = vector.load %arg4[%c0_15, %c0_16] : memref<1x300xf32, #tpu.memory_space<vmem>>, vector<1x300xf32>
    %10 = vector.broadcast %9 : vector<1x300xf32> to vector<16x300xf32>
    %11 = arith.addf %8, %10 : vector<16x300xf32>
    %c0_17 = arith.constant 0 : index
    %c0_18 = arith.constant 0 : index
    %12 = vector.load %arg7[%c0_17, %c0_18] : memref<300x300xf32, #tpu.memory_space<vmem>>, vector<300x300xf32>
    %cst_19 = arith.constant dense<0.000000e+00> : vector<16x300xf32>
    %13 = tpu.matmul %11, %12, %cst_19 {dimension_numbers = #tpu.dot_dimension_numbers<[1], [0], [0], [1], [0, 0, 1, 1], [], []>} : vector<16x300xf32>, vector<300x300xf32>, vector<16x300xf32> -> vector<16x300xf32>
    %14 = vector.shape_cast %11 : vector<16x300xf32> to vector<2x8x300xf32>
    %15 = vector.shape_cast %13 : vector<16x300xf32> to vector<2x8x300xf32>
    "tpu.trace_start"() <{level = 10 : i32, message = "bnd,bmd->bnm"}> : () -> ()
    %cst_20 = arith.constant dense<0.000000e+00> : vector<2x8x6xf32>
    %16 = tpu.matmul %15, %5, %cst_20 {dimension_numbers = #tpu.dot_dimension_numbers<[2], [2], [1], [1], [0, 0, 0, 1, 1, 1], [0], [0]>} : vector<2x8x300xf32>, vector<2x6x300xf32>, vector<2x8x6xf32> -> vector<2x8x6xf32>
    "tpu.trace_stop"() : () -> ()
    %17 = math.tanh %16 : vector<2x8x6xf32>
    %cst_21 = arith.constant dense<0xFF800000> : vector<2x8xf32>
    %18 = vector.multi_reduction <maximumf>, %17, %cst_21 [2] : vector<2x8x6xf32> to vector<2x8xf32>
    %cst_22 = arith.constant dense<0xFF800000> : vector<2x6xf32>
    %19 = vector.multi_reduction <maximumf>, %17, %cst_22 [1] : vector<2x8x6xf32> to vector<2x6xf32>
    %cst_23 = arith.constant 0.000000e+00 : f32
    %20 = vector.broadcast %cst_23 : f32 to vector<2x8xf32>
    %21 = arith.cmpf oeq, %18, %20 : vector<2x8xf32>
    %cst_24 = arith.constant -1.000000e+09 : f32
    %22 = vector.broadcast %cst_24 : f32 to vector<2x8xf32>
    %23 = arith.select %21, %22, %18 : vector<2x8xi1>, vector<2x8xf32>
    %cst_25 = arith.constant dense<0xFF800000> : vector<2xf32>
    %24 = vector.multi_reduction <maximumf>, %23, %cst_25 [1] : vector<2x8xf32> to vector<2xf32>
    %25 = vector.shape_cast %24 : vector<2xf32> to vector<2x1xf32>
    %26 = vector.broadcast %25 : vector<2x1xf32> to vector<2x8xf32>
    %27 = arith.subf %23, %26 : vector<2x8xf32>
    %28 = math.exp %27 : vector<2x8xf32>
    %cst_26 = arith.constant dense<0.000000e+00> : vector<2xf32>
    %29 = vector.multi_reduction <add>, %28, %cst_26 [1] : vector<2x8xf32> to vector<2xf32>
    %30 = vector.shape_cast %29 : vector<2xf32> to vector<2x1xf32>
    %31 = vector.broadcast %30 : vector<2x1xf32> to vector<2x8xf32>
    %32 = arith.divf %28, %31 : vector<2x8xf32>
    %cst_27 = arith.constant 0.000000e+00 : f32
    %33 = vector.broadcast %cst_27 : f32 to vector<2x6xf32>
    %34 = arith.cmpf oeq, %19, %33 : vector<2x6xf32>
    %cst_28 = arith.constant -1.000000e+09 : f32
    %35 = vector.broadcast %cst_28 : f32 to vector<2x6xf32>
    %36 = arith.select %34, %35, %19 : vector<2x6xi1>, vector<2x6xf32>
    %cst_29 = arith.constant dense<0xFF800000> : vector<2xf32>
    %37 = vector.multi_reduction <maximumf>, %36, %cst_29 [1] : vector<2x6xf32> to vector<2xf32>
    %38 = vector.shape_cast %37 : vector<2xf32> to vector<2x1xf32>
    %39 = vector.broadcast %38 : vector<2x1xf32> to vector<2x6xf32>
    %40 = arith.subf %36, %39 : vector<2x6xf32>
    %41 = math.exp %40 : vector<2x6xf32>
    %cst_30 = arith.constant dense<0.000000e+00> : vector<2xf32>
    %42 = vector.multi_reduction <add>, %41, %cst_30 [1] : vector<2x6xf32> to vector<2xf32>
    %43 = vector.shape_cast %42 : vector<2xf32> to vector<2x1xf32>
    %44 = vector.broadcast %43 : vector<2x1xf32> to vector<2x6xf32>
    %45 = arith.divf %41, %44 : vector<2x6xf32>
    %46 = vector.shape_cast %32 : vector<2x8xf32> to vector<2x8x1xf32>
    %47 = vector.broadcast %46 : vector<2x8x1xf32> to vector<2x8x300xf32>
    %48 = arith.mulf %47, %14 : vector<2x8x300xf32>
    %cst_31 = arith.constant dense<0.000000e+00> : vector<2x300xf32>
    %49 = vector.multi_reduction <add>, %48, %cst_31 [1] : vector<2x8x300xf32> to vector<2x300xf32>
    %50 = vector.shape_cast %45 : vector<2x6xf32> to vector<2x6x1xf32>
    %51 = vector.broadcast %50 : vector<2x6x1xf32> to vector<2x6x300xf32>
    %52 = arith.mulf %51, %5 : vector<2x6x300xf32>
    %cst_32 = arith.constant dense<0.000000e+00> : vector<2x300xf32>
    %53 = vector.multi_reduction <add>, %52, %cst_32 [1] : vector<2x6x300xf32> to vector<2x300xf32>
    %c0_33 = arith.constant 0 : index
    %c0_34 = arith.constant 0 : index
    %54 = vector.load %arg8[%c0_33, %c0_34] : memref<300x2xf32, #tpu.memory_space<vmem>>, vector<300x2xf32>
    %cst_35 = arith.constant dense<0.000000e+00> : vector<2x2xf32>
    %55 = tpu.matmul %53, %54, %cst_35 {dimension_numbers = #tpu.dot_dimension_numbers<[1], [0], [0], [1], [0, 0, 1, 1], [], []>} : vector<2x300xf32>, vector<300x2xf32>, vector<2x2xf32> -> vector<2x2xf32>
    %56 = vector.shape_cast %55 : vector<2x2xf32> to vector<2x2x1xf32>
    %57 = vector.shape_cast %49 : vector<2x300xf32> to vector<2x1x300xf32>
    %58 = vector.broadcast %56 : vector<2x2x1xf32> to vector<2x2x300xf32>
    %59 = vector.broadcast %57 : vector<2x1x300xf32> to vector<2x2x300xf32>
    %60 = arith.mulf %58, %59 : vector<2x2x300xf32>
    %c0_36 = arith.constant 0 : index
    %c0_37 = arith.constant 0 : index
    %61 = vector.load %arg9[%c0_36, %c0_37] : memref<1x2xf32, #tpu.memory_space<vmem>>, vector<1x2xf32>
    %62 = vector.shape_cast %61 : vector<1x2xf32> to vector<1x2x1xf32>
    %63 = vector.broadcast %62 : vector<1x2x1xf32> to vector<2x2x300xf32>
    %64 = arith.addf %60, %63 : vector<2x2x300xf32>
    %c0_38 = arith.constant 0 : index
    %c0_39 = arith.constant 0 : index
    %c0_40 = arith.constant 0 : index
    %65 = vector.load %arg10[%c0_38, %c0_39, %c0_40] : memref<2x2x300xf32, #tpu.memory_space<vmem>>, vector<2x2x300xf32>
    tpu.vector_store %arg10[%c0_38, %c0_39, %c0_40], %64 {strides = array<i32>} : memref<2x2x300xf32, #tpu.memory_space<vmem>>, vector<2x2x300xf32>,
    return
  }
  func.func @transform_0(%arg0: i32) -> (i32, i32, i32) {
    %c0_i32 = arith.constant 0 : i32
    %c0_i32_0 = arith.constant 0 : i32
    %c0_i32_1 = arith.constant 0 : i32
    return %arg0, %c0_i32, %c0_i32_0 : i32, i32, i32
  }
  func.func @transform_1(%arg0: i32) -> (i32, i32, i32) {
    %c0_i32 = arith.constant 0 : i32
    %c0_i32_0 = arith.constant 0 : i32
    %c0_i32_1 = arith.constant 0 : i32
    return %arg0, %c0_i32, %c0_i32_0 : i32, i32, i32
  }
  func.func @transform_2(%arg0: i32) -> (i32, i32) {
    %c0_i32 = arith.constant 0 : i32
    %c0_i32_0 = arith.constant 0 : i32
    %c0_i32_1 = arith.constant 0 : i32
    return %c0_i32, %c0_i32_0 : i32, i32
  }
  func.func @transform_3(%arg0: i32) -> (i32, i32) {
    %c0_i32 = arith.constant 0 : i32
    %c0_i32_0 = arith.constant 0 : i32
    %c0_i32_1 = arith.constant 0 : i32
    return %c0_i32, %c0_i32_0 : i32, i32
  }
  func.func @transform_4(%arg0: i32) -> (i32, i32, i32) {
    %c0_i32 = arith.constant 0 : i32
    %c0_i32_0 = arith.constant 0 : i32
    %c0_i32_1 = arith.constant 0 : i32
    return %arg0, %c0_i32, %c0_i32_0 : i32, i32, i32
  }
  func.func @transform_5(%arg0: i32) -> (i32, i32, i32) {
    %c0_i32 = arith.constant 0 : i32
    %c0_i32_0 = arith.constant 0 : i32
    %c0_i32_1 = arith.constant 0 : i32
    return %arg0, %c0_i32, %c0_i32_0 : i32, i32, i32
  }
  func.func @transform_6(%arg0: i32) -> (i32, i32) {
    %c0_i32 = arith.constant 0 : i32
    %c0_i32_0 = arith.constant 0 : i32
    %c0_i32_1 = arith.constant 0 : i32
    return %c0_i32, %c0_i32_0 : i32, i32
  }
  func.func @transform_7(%arg0: i32) -> (i32, i32) {
    %c0_i32 = arith.constant 0 : i32
    %c0_i32_0 = arith.constant 0 : i32
    %c0_i32_1 = arith.constant 0 : i32
    return %c0_i32, %c0_i32_0 : i32, i32
  }
  func.func @transform_8(%arg0: i32) -> (i32, i32) {
    %c0_i32 = arith.constant 0 : i32
    %c0_i32_0 = arith.constant 0 : i32
    %c0_i32_1 = arith.constant 0 : i32
    return %c0_i32, %c0_i32_0 : i32, i32
  }
  func.func @transform_9(%arg0: i32) -> (i32, i32, i32) {
    %c0_i32 = arith.constant 0 : i32
    %c0_i32_0 = arith.constant 0 : i32
    %c0_i32_1 = arith.constant 0 : i32
    return %arg0, %c0_i32, %c0_i32_0 : i32, i32, i32
  }
}

</mosaic_0001>

<bundles_post_ra>
// kernel: tpu_custom_call.1
= control target key start
LH: loop header
LB: loop body
LE: loop exit
PB: predicated region body
PF: predicated region fallthrough
CT: control target
= control target key end

     0   :  { %14 = vsyncpa [#allocation3], 0  ;;  %s1869_s0 = inlined_call_operand.vmem [shape: f32[2,8,16], index: 0, kind: input, shape index: {}]   ;;  %s1870_s1 = inlined_call_operand.vmem [shape: f32[2,16,20], index: 1, kind: input, shape index: {}]   ;;  %s1871_s2 = inlined_call_operand.vmem [shape: f32[20,300], index: 2, kind: input, shape index: {}]   ;;  %s1872_s3 = inlined_call_operand.vmem [shape: f32[1,300], index: 3, kind: input, shape index: {}]   ;;  %s1873_s4 = inlined_call_operand.vmem [shape: f32[2,6,12], index: 4, kind: input, shape index: {}]   ;;  %s1874_s5 = inlined_call_operand.vmem [shape: f32[2,12,300], index: 5, kind: input, shape index: {}]   ;;  %s1875_s6 = inlined_call_operand.hbm [shape: f32[300,300], index: 6, kind: input, shape index: {}]   ;;  %s1876_s7 = inlined_call_operand.vmem [shape: f32[300,2], index: 7, kind: input, shape index: {}]   ;;  %s1877_s8 = inlined_call_operand.vmem [shape: f32[1,2], index: 8, kind: input, shape index: {}]   ;;  %s1878_s9 = inlined_call_operand.hbm [shape: f32[2,2,300], index: 9, kind: output, shape index: {}]  }
   0x1   :  { %15 = vsyncpa [#allocation4], 0  ;;  %s32_s11 = sshll.u32 %s1875_s6, 4  ;;  %s1429_s12 = smov [#allocation2]   ;;  %s33_s11 = int_to_ptr.hbm [resolvable:$true] %s32_s11 }
   0x2   :  { %s34_s13 = sshll.u32 %s1429_s12, 4  ;;  %s1430_s14 = smov 384   ;;  %s35_s13 = int_to_ptr.vmem [resolvable:$true] %s34_s13 }
   0x3   :  { %s1431_s15 = smov 24  }
   0x4   :  { %40 = dma.hbm_to_vmem [thread:$0]  %s33_s11, 14592, %s35_s13, [#allocation3], %s1430_s14, %s1430_s14, %s1431_s15  }
   0x5   :  { %1425 = dma.done.wait [#allocation3], 14592  }
   0x6   :  { %1426 = vsyncadd [#allocation3], 4294952704  ;;  %v52_v0 = vld [vmem:[%s1870_s1 + $0x8] sm:$0xff]  ;;  %v51_v1 = vld [vmem:[%s1870_s1] sm:$0xff]  ;;  %vm120_vm0 = vcmask 1043456   ;;  %vm55_vm1 = vcmask 130048  }
   0x7   :  { %73 = vmatpush.msra.mxu0 %v52_v0  ;;  %v49_v2 = vld [vmem:[%s1869_s0] sm:$0xff]  ;;  %v54_v3 = vld [vmem:[%s1870_s1 + $0x18] sm:$0xff]  ;;  %v53_v4 = vld [vmem:[%s1870_s1 + $0x10] sm:$0xff]  ;;  %vm116_vm2 = vcmask 97280   ;;  %vm279_vm3 = vcmask 162816   ;;  %vm478_vm4 = vcmask 359424  }
   0x8   :  { %96 = vmatpush.msra.mxu1 %v54_v3  ;;  %v50_v5 = vld [vmem:[%s1869_s0 + $0x8] sm:$0xff]  ;;  %v107_v6 = vld [vmem:[%s1874_s5 + $0x18] sm:$0xf]  ;;  %v104_v7 = vld [vmem:[%s1874_s5] sm:$0xff]  ;;  %vm835_vm5 = vcmask 48128   ;;  %vm864_vm7 = vcmask 1041409  }
   0x9   :  { %74 = vmatpush.msra.mxu0 %v51_v1  ;;  %1306 = vmatpush.msk.msra.mxu2 %vm120_vm0, %v107_v6  ;;  %v102_v8 = vld [vmem:[%s1873_s4] sm:$0x3f]  ;;  %v109_v9 = vld [vmem:[%s1874_s5 + $0x28] sm:$0xf]  ;;  %v106_v12 = vld [vmem:[%s1874_s5 + $0x10] sm:$0xff]  ;;  %vm940_vm9 = vcmask 41984  }
   0xa   :  { %1304 = vmatmul.msk.f32.vlgmr.msra.gmra.mxu0 %vm55_vm1, %v49_v2  ;;  %97 = vmatpush.msra.mxu1 %v53_v4  ;;  %v108_v10 = vld [vmem:[%s1874_s5 + $0x20] sm:$0xf]  ;;  %v113_v11 = vld [vmem:[%s1874_s5 + $0x48] sm:$0xf]  ;;  %v110_v14 = vld [vmem:[%s1874_s5 + $0x30] sm:$0xff]  ;;  %vm867_vm12 = vcmask 58368  }
   0xb   :  { %1305 = vmatmul.msk.f32.vlgmr.msra.gmra.mxu1 %vm55_vm1, %v50_v5  ;;  %145 = vmatpush.msra.mxu2 %v104_v7  ;;  %v105_v13 = vld [vmem:[%s1874_s5 + $0x8] sm:$0xff]  ;;  %v114_v15 = vld [vmem:[%s1874_s5 + $0x50] sm:$0xf]  ;;  %v269_v17 = vld [vmem:[%s1871_s2 + $0x38] sm:$0xf]  ;;  %s1434_s22 = smov 96  }
   0xc   :  { %1307 = vmatmul.msk.f32.vlgmr.msra.gmra.mxu2 %vm116_vm2, %v102_v8  ;;  %1310 = vmatpush.msk.msrb.mxu0 %vm120_vm0, %v109_v9  ;;  %v268_v16 = vld [vmem:[%s1871_s2 + $0x30] sm:$0xf]  ;;  %v111_v18 = vld [vmem:[%s1874_s5 + $0x38] sm:$0xff]  ;;  %v1557_v19 = vld [vmem:[%s1873_s4 + $0x8] sm:$0x3f] }
   0xd   :  { %1308 = vmatpush.msk.msrb.mxu2 %vm120_vm0, %v108_v10  ;;  %1312 = vmatpush.msk.msrb.mxu1 %vm120_vm0, %v113_v11  ;;  %v265_v20 = vld [vmem:[%s1871_s2 + $0x18] sm:$0xff]  ;;  %v266_v21 = vld [vmem:[%s1871_s2 + $0x20] sm:$0xff]  ;;  %v267_v24 = vld [vmem:[%s1871_s2 + $0x28] sm:$0xff] }
   0xe   :  { %185 = vmatpush.msrb.mxu0 %v106_v12  ;;  %v270_v22 = vld [vmem:[%s1871_s2 + $0x40] sm:$0xf]  ;;  %v263_v25 = vld [vmem:[%s1871_s2 + $0x8] sm:$0xff]  ;;  %v264_v26 = vld [vmem:[%s1871_s2 + $0x10] sm:$0xff] }
   0xf   :  { %165 = vmatpush.msrb.mxu2 %v105_v13  ;;  %217 = vmatpush.msrb.mxu1 %v110_v14  ;;  %v262_v23 = vld [vmem:[%s1871_s2] sm:$0xff]  ;;  %v410_v27 = vld [vmem:[#allocation2 + $0x170] sm:$0xff]  ;;  %v407_v28 = vld [vmem:[#allocation2 + $0x158] sm:$0xff]  ;;  %s1291_s2 = sshll.u32 %s1878_s9, 4  ;;  %s1292_s2 = int_to_ptr.hbm [resolvable:$true] %s1291_s2 }
  0x10   :  { %1318 = vmatpush.msk.msra.mxu0 %vm120_vm0, %v268_v16  ;;  %v457_v29 = vld [vmem:[#allocation2 + $0x2e8] sm:$0xff]  ;;  %v454_v30 = vld [vmem:[#allocation2 + $0x2d0] sm:$0xff]  ;;  %v404_v31 = vld [vmem:[#allocation2 + $0x140] sm:$0xff] }
  0x11   :  { %1314 = vmatpush.msk.msra.mxu2 %vm120_vm0, %v114_v15  ;;  %1321 = vmatpush.msk.msra.mxu1 %vm120_vm0, %v269_v17  ;;  %v451_v32 = vld [vmem:[#allocation2 + $0x2b8] sm:$0xff]  ;;  %v401_v34 = vld [vmem:[#allocation2 + $0x128] sm:$0xff]  ;;  %v112_v35 = vld [vmem:[%s1874_s5 + $0x40] sm:$0xff] }
  0x12   :  { %1311 = vmatmul.msk.f32.vlgmr.msrb.gmra.mxu0 %vm116_vm2, %v102_v8  ;;  %v115_v33 = vld [vmem:[%s1874_s5 + $0x58] sm:$0xf]  ;;  %v448_v36 = vld [vmem:[#allocation2 + $0x2a0] sm:$0xff]  ;;  %v409_v37 = vld [vmem:[#allocation2 + $0x168] sm:$0xff]  ;;  %s1435_s5 = smov 6  }
  0x13   :  { %237 = vmatpush.msra.mxu2 %v111_v18  ;;  %1313 = vmatmul.msk.f32.vlgmr.msrb.gmra.mxu1 %vm116_vm2, %v1557_v19  ;;  %v475_v38 = vld [vmem:[#allocation2 + $0x378] sm:$0xf]  ;;  %v398_v39 = vld [vmem:[#allocation2 + $0x110] sm:$0xff]  ;;  %v445_v41 = vld [vmem:[#allocation2 + $0x288] sm:$0xff] }
  0x14   :  { %309 = vmatpush.msra.mxu0 %v265_v20  ;;  %1309 = vmatmul.msk.f32.vlgmr.msrb.gmra.mxu2 %vm116_vm2, %v102_v8  ;;  %v406_v40 = vld [vmem:[#allocation2 + $0x150] sm:$0xff]  ;;  %v472_v42 = vld [vmem:[#allocation2 + $0x360] sm:$0xff]  ;;  %v395_v43 = vld [vmem:[#allocation2 + $0xf8] sm:$0xff] }
  0x15   :  { %332 = vmatpush.msra.mxu1 %v266_v21  ;;  %1324 = vmatpush.msk.msrb.mxu2 %vm120_vm0, %v270_v22  ;;  %v403_v44 = vld [vmem:[#allocation2 + $0x138] sm:$0xff]  ;;  %v442_v45 = vld [vmem:[#allocation2 + $0x270] sm:$0xff]  ;;  %v469_v46 = vld [vmem:[#allocation2 + $0x348] sm:$0xff] }
  0x16   :  { %310 = vmatpush.msra.mxu0 %v262_v23  ;;  %1316 = vmatpush.msk.msra.mxu3 %vm120_vm0, %v115_v33  ;;  %v392_v47 = vld [vmem:[#allocation2 + $0xe0] sm:$0xff]  ;;  %v439_v49 = vld [vmem:[#allocation2 + $0x258] sm:$0xff]  ;;  %v466_v50 = vld [vmem:[#allocation2 + $0x330] sm:$0xff] }
  0x17   :  { %355 = vmatpush.msrb.mxu2 %v267_v24  ;;  %333 = vmatpush.msra.mxu1 %v263_v25  ;;  %v400_v48 = vld [vmem:[#allocation2 + $0x120] sm:$0xff]  ;;  %v389_v51 = vld [vmem:[#allocation2 + $0xc8] sm:$0xff]  ;;  %v463_v54 = vld [vmem:[#allocation2 + $0x318] sm:$0xff] }
  0x18   :  { %517 = vmatpush.msrb.mxu0 %v457_v29  ;;  %257 = vmatpush.msra.mxu3 %v112_v35  ;;  %v397_v52 = vld [vmem:[#allocation2 + $0x108] sm:$0xff]  ;;  %v436_v53 = vld [vmem:[#allocation2 + $0x240] sm:$0xff]  ;;  %v386_v55 = vld [vmem:[#allocation2 + $0xb0] sm:$0xff] }
  0x19   :  { %356 = vmatpush.msrb.mxu2 %v264_v26  ;;  %1327 = vmatpush.msk.msrb.mxu1 %vm120_vm0, %v475_v38  ;;  %v394_v56 = vld [vmem:[#allocation2 + $0xf0] sm:$0xff]  ;;  %v433_v57 = vld [vmem:[#allocation2 + $0x228] sm:$0xff]  ;;  %v460_v58 = vld [vmem:[#allocation2 + $0x300] sm:$0xff] }
  0x1a   :  { %518 = vmatpush.msrb.mxu0 %v454_v30  ;;  %494 = vmatpush.msrb.mxu3 %v409_v37  ;;  %v383_v59 = vld [vmem:[#allocation2 + $0x98] sm:$0xff]  ;;  %v430_v61 = vld [vmem:[#allocation2 + $0x210] sm:$0xff]  ;;  %v380_v62 = vld [vmem:[#allocation2 + $0x80] sm:$0xff] }
  0x1b   :  { %551 = vmatpush.msrb.mxu1 %v472_v42  ;;  %v391_v60 = vld [vmem:[#allocation2 + $0xd8] sm:$0xff]  ;;  %v388_v63 = vld [vmem:[#allocation2 + $0xc0] sm:$0xff]  ;;  %1317 = vmatmul.msk.f32.vlgmr.msra.gmra.mxu3 %vm116_vm2, %v1557_v19  ;;  %v458_v1 = vld [vmem:[#allocation2 + $0x2f0] sm:$0xff] }
  0x1c   :  { %1315 = vmatmul.msk.f32.vlgmr.msra.gmra.mxu2 %vm116_vm2, %v1557_v19  ;;  %519 = vmatpush.msrb.mxu0 %v451_v32  ;;  %v427_v0 = vld [vmem:[#allocation2 + $0x1f8] sm:$0xff]  ;;  %v377_v3 = vld [vmem:[#allocation2 + $0x68] sm:$0xff]  ;;  %v424_v4 = vld [vmem:[#allocation2 + $0x1e0] sm:$0xff] }
  0x1d   :  { %563 = vmatpush.msra.mxu2 %v410_v27  ;;  %495 = vmatpush.msrb.mxu3 %v406_v40  ;;  %v455_v5 = vld [vmem:[#allocation2 + $0x2d8] sm:$0xff]  ;;  %v385_v6 = vld [vmem:[#allocation2 + $0xa8] sm:$0xff]  ;;  %v374_v7 = vld [vmem:[#allocation2 + $0x50] sm:$0xff] }
  0x1e   :  { %520 = vmatpush.msrb.mxu0 %v448_v36  ;;  %552 = vmatpush.msrb.mxu1 %v469_v46  ;;  %v421_v8 = vld [vmem:[#allocation2 + $0x1c8] sm:$0xff]  ;;  %v452_v9 = vld [vmem:[#allocation2 + $0x2c0] sm:$0xff]  ;;  %v382_v10 = vld [vmem:[#allocation2 + $0x90] sm:$0xff] }
  0x1f   :  { %564 = vmatpush.msra.mxu2 %v407_v28  ;;  %496 = vmatpush.msrb.mxu3 %v403_v44  ;;  %v371_v11 = vld [vmem:[#allocation2 + $0x38] sm:$0xff]  ;;  %v418_v12 = vld [vmem:[#allocation2 + $0x1b0] sm:$0xff]  ;;  %v449_v13 = vld [vmem:[#allocation2 + $0x2a8] sm:$0xff] }
  0x20   :  { %521 = vmatpush.msrb.mxu0 %v445_v41  ;;  %553 = vmatpush.msrb.mxu1 %v466_v50  ;;  %v379_v14 = vld [vmem:[#allocation2 + $0x78] sm:$0xff]  ;;  %v368_v17 = vld [vmem:[#allocation2 + $0x20] sm:$0xff]  ;;  %v446_v18 = vld [vmem:[#allocation2 + $0x290] sm:$0xff] }
  0x21   :  { %565 = vmatpush.msra.mxu2 %v404_v31  ;;  %497 = vmatpush.msrb.mxu3 %v400_v48  ;;  %v415_v16 = vld [vmem:[#allocation2 + $0x198] sm:$0xff]  ;;  %v412_v19 = vld [vmem:[#allocation2 + $0x180] sm:$0xff]  ;;  %v365_v21 = vld [vmem:[#allocation2 + $0x8] sm:$0xff] }
  0x22   :  { %522 = vmatpush.msrb.mxu0 %v442_v45  ;;  %554 = vmatpush.msrb.mxu1 %v463_v54  ;;  %v376_v20 = vld [vmem:[#allocation2 + $0x60] sm:$0xff]  ;;  %v443_v22 = vld [vmem:[#allocation2 + $0x278] sm:$0xff]  ;;  %v373_v25 = vld [vmem:[#allocation2 + $0x48] sm:$0xff] }
  0x23   :  { %566 = vmatpush.msra.mxu2 %v401_v34  ;;  %498 = vmatpush.msrb.mxu3 %v397_v52  ;;  %v459_v23 = vld [vmem:[#allocation2 + $0x2f8] sm:$0xff]  ;;  %v440_v26 = vld [vmem:[#allocation2 + $0x260] sm:$0xff]  ;;  %v370_v29 = vld [vmem:[#allocation2 + $0x30] sm:$0xff] }
  0x24   :  { %523 = vmatpush.msrb.mxu0 %v439_v49  ;;  %555 = vmatpush.msrb.mxu1 %v460_v58  ;;  %v411_v24 = vld [vmem:[#allocation2 + $0x178] sm:$0xff]  ;;  %v456_v27 = vld [vmem:[#allocation2 + $0x2e0] sm:$0xff]  ;;  %v437_v30 = vld [vmem:[#allocation2 + $0x248] sm:$0xff] }
  0x25   :  { %567 = vmatpush.msra.mxu2 %v398_v39  ;;  %499 = vmatpush.msrb.mxu3 %v394_v56  ;;  %v408_v28 = vld [vmem:[#allocation2 + $0x160] sm:$0xff]  ;;  %v453_v31 = vld [vmem:[#allocation2 + $0x2c8] sm:$0xff]  ;;  %v367_v33 = vld [vmem:[#allocation2 + $0x18] sm:$0xff] }
  0x26   :  { %524 = vmatpush.msrb.mxu0 %v436_v53  ;;  %v405_v32 = vld [vmem:[#allocation2 + $0x148] sm:$0xff]  ;;  %v434_v34 = vld [vmem:[#allocation2 + $0x230] sm:$0xff]  ;;  %v364_v37 = vld [vmem:[#allocation2] sm:$0xff] }
  0x27   :  { %568 = vmatpush.msra.mxu2 %v395_v43  ;;  %500 = vmatpush.msrb.mxu3 %v391_v60  ;;  %v450_v35 = vld [vmem:[#allocation2 + $0x2b0] sm:$0xff]  ;;  %v431_v38 = vld [vmem:[#allocation2 + $0x218] sm:$0xff]  ;;  %v476_v41 = vld [vmem:[#allocation2 + $0x380] sm:$0xf] }
  0x28   :  { %525 = vmatpush.msrb.mxu0 %v433_v57  ;;  %v402_v36 = vld [vmem:[#allocation2 + $0x130] sm:$0xff]  ;;  %v447_v39 = vld [vmem:[#allocation2 + $0x298] sm:$0xff]  ;;  %v428_v42 = vld [vmem:[#allocation2 + $0x200] sm:$0xff] }
  0x29   :  { %569 = vmatpush.msra.mxu2 %v392_v47  ;;  %501 = vmatpush.msrb.mxu3 %v388_v63  ;;  %v399_v40 = vld [vmem:[#allocation2 + $0x118] sm:$0xff]  ;;  %v444_v43 = vld [vmem:[#allocation2 + $0x280] sm:$0xff]  ;;  %v473_v45 = vld [vmem:[#allocation2 + $0x368] sm:$0xff] }
  0x2a   :  { %526 = vmatpush.msrb.mxu0 %v430_v61  ;;  %v396_v44 = vld [vmem:[#allocation2 + $0x100] sm:$0xff]  ;;  %v441_v46 = vld [vmem:[#allocation2 + $0x268] sm:$0xff]  ;;  %v438_v47 = vld [vmem:[#allocation2 + $0x250] sm:$0xff] }
  0x2b   :  { %570 = vmatpush.msra.mxu2 %v389_v51  ;;  %502 = vmatpush.msrb.mxu3 %v385_v6  ;;  %v435_v48 = vld [vmem:[#allocation2 + $0x238] sm:$0xff]  ;;  %v425_v49 = vld [vmem:[#allocation2 + $0x1e8] sm:$0xff]  ;;  %v432_v51 = vld [vmem:[#allocation2 + $0x220] sm:$0xff] }
  0x2c   :  { %527 = vmatpush.msrb.mxu0 %v427_v0  ;;  %v393_v50 = vld [vmem:[#allocation2 + $0xe8] sm:$0xff]  ;;  %v470_v52 = vld [vmem:[#allocation2 + $0x350] sm:$0xff]  ;;  %v467_v56 = vld [vmem:[#allocation2 + $0x338] sm:$0xff] }
  0x2d   :  { %571 = vmatpush.msra.mxu2 %v386_v55  ;;  %503 = vmatpush.msrb.mxu3 %v382_v10  ;;  %v422_v53 = vld [vmem:[#allocation2 + $0x1d0] sm:$0xff]  ;;  %v429_v55 = vld [vmem:[#allocation2 + $0x208] sm:$0xff]  ;;  %v419_v57 = vld [vmem:[#allocation2 + $0x1b8] sm:$0xff] }
  0x2e   :  { %528 = vmatpush.msrb.mxu0 %v424_v4  ;;  %v390_v54 = vld [vmem:[#allocation2 + $0xd0] sm:$0xff]  ;;  %v387_v58 = vld [vmem:[#allocation2 + $0xb8] sm:$0xff]  ;;  %v464_v60 = vld [vmem:[#allocation2 + $0x320] sm:$0xff] }
  0x2f   :  { %572 = vmatpush.msra.mxu2 %v383_v59  ;;  %504 = vmatpush.msrb.mxu3 %v379_v14  ;;  %v426_v59 = vld [vmem:[#allocation2 + $0x1f0] sm:$0xff]  ;;  %v416_v61 = vld [vmem:[#allocation2 + $0x1a0] sm:$0xff]  ;;  %v423_v63 = vld [vmem:[#allocation2 + $0x1d8] sm:$0xff] }
  0x30   :  { %529 = vmatpush.msrb.mxu0 %v421_v8  ;;  %v461_v0 = vld [vmem:[#allocation2 + $0x308] sm:$0xff]  ;;  %v414_v8 = vld [vmem:[#allocation2 + $0x190] sm:$0xff] }
  0x31   :  { %573 = vmatpush.msra.mxu2 %v380_v62  ;;  %505 = vmatpush.msrb.mxu3 %v376_v20  ;;  %v384_v62 = vld [vmem:[#allocation2 + $0xa0] sm:$0xff]  ;;  %v417_v6 = vld [vmem:[#allocation2 + $0x1a8] sm:$0xff] }
  0x32   :  { %530 = vmatpush.msrb.mxu0 %v418_v12  ;;  %v369_v10 = vld [vmem:[#allocation2 + $0x28] sm:$0xff] }
  0x33   :  { %574 = vmatpush.msra.mxu2 %v377_v3  ;;  %506 = vmatpush.msrb.mxu3 %v373_v25  ;;  %v420_v3 = vld [vmem:[#allocation2 + $0x1c0] sm:$0xff] }
  0x34   :  { %531 = vmatpush.msrb.mxu0 %v415_v16 }
  0x35   :  { %575 = vmatpush.msra.mxu2 %v374_v7  ;;  %507 = vmatpush.msrb.mxu3 %v370_v29  ;;  %v375_v7 = vld [vmem:[#allocation2 + $0x58] sm:$0xff] }
  0x36   :  { %532 = vmatpush.msrb.mxu0 %v412_v19 }
  0x37   :  { %576 = vmatpush.msra.mxu2 %v371_v11  ;;  %508 = vmatpush.msrb.mxu3 %v367_v33  ;;  %v366_v11 = vld [vmem:[#allocation2 + $0x10] sm:$0xff] }
  0x39   :  { %577 = vmatpush.msra.mxu2 %v368_v17  ;;  %509 = vmatpush.msrb.mxu3 %v364_v37 }
  0x3b   :  { %578 = vmatpush.msra.mxu2 %v365_v21  ;;  %1330 = vmatpush.msk.msra.mxu3 %vm120_vm0, %v476_v41 }
  0x3d   :  { %620 = vmatpush.msra.mxu3 %v473_v45 }
  0x3f   :  { %621 = vmatpush.msra.mxu3 %v470_v52 }
  0x41   :  { %622 = vmatpush.msra.mxu3 %v467_v56 }
  0x43   :  { %623 = vmatpush.msra.mxu3 %v464_v60 }
  0x45   :  { %624 = vmatpush.msra.mxu3 %v461_v0 }
  0x87   :  { %v76_v2 = vpop.f32.mrf.mxu0 }
  0x88   :  { %1319 = vmatmul.msk.f32.vlgmr.msra.gmra.mxu0 %vm279_vm3, %v76_v2  ;;  %1322 = vmatmul.msk.f32.vlgmr.msra.gmra.mxu1 %vm279_vm3, %v76_v2  ;;  %v99_v15 = vpop.f32.mrf.mxu1 }
  0x89   :  { %1325 = vmatmul.msk.f32.vlgmr.msrb.gmra.mxu2 %vm279_vm3, %v76_v2  ;;  %586 = vmatpush.msra.mxu1 %v458_v1  ;;  %v413_v1 = vld [vmem:[#allocation2 + $0x188] sm:$0xff] }
  0x8a   :  { %655 = vmatpush.msrb.mxu2 %v459_v23  ;;  %632 = vmatpush.msra.mxu0 %v411_v24  ;;  %v381_v2 = vld [vmem:[#allocation2 + $0x88] sm:$0xff]  ;;  %v474_v24 = vld [vmem:[#allocation2 + $0x370] sm:$0xff] }
  0x8b   :  { %587 = vmatpush.msra.mxu1 %v455_v5  ;;  %v378_v5 = vld [vmem:[#allocation2 + $0x70] sm:$0xff]  ;;  %v477_v23 = vld [vmem:[#allocation2 + $0x388] sm:$0xf] }
  0x8c   :  { %656 = vmatpush.msrb.mxu2 %v456_v27  ;;  %633 = vmatpush.msra.mxu0 %v408_v28  ;;  %v468_v28 = vld [vmem:[#allocation2 + $0x340] sm:$0xff] }
  0x8d   :  { %588 = vmatpush.msra.mxu1 %v452_v9  ;;  %v372_v9 = vld [vmem:[#allocation2 + $0x40] sm:$0xff] }
  0x8e   :  { %657 = vmatpush.msrb.mxu2 %v453_v31  ;;  %634 = vmatpush.msra.mxu0 %v405_v32 }
  0x8f   :  { %589 = vmatpush.msra.mxu1 %v449_v13  ;;  %v1606_v4 = vpop.f32.mrf.mxu2  ;;  %v1610_v13 = vpop.f32.mrf.mxu0 }
  0x90   :  { %1320 = vmatmul.msk.f32.gmra.mxu0 %vm279_vm3, %v99_v15  ;;  %1323 = vmatmul.msk.f32.gmra.mxu1 %vm279_vm3, %v99_v15  ;;  %v1612_v14 = vpop.f32.mrf.mxu1 }
  0x91   :  { %1326 = vmatmul.msk.f32.gmra.mxu2 %vm279_vm3, %v99_v15  ;;  %590 = vmatpush.msra.mxu1 %v446_v18  ;;  %v271_v15 = vld [vmem:[%s1872_s3] sm:$0x7] }
  0x92   :  { %658 = vmatpush.msrb.mxu2 %v450_v35  ;;  %635 = vmatpush.msra.mxu0 %v402_v36  ;;  %v273_v17 = vperm.slane %v271_v15, 0  ;;  %v274_v18 = vperm.slane %v271_v15, 1  ;;  %v275_v25 = vperm.slane %v271_v15, 2  ;;  %v462_v35 = vld [vmem:[#allocation2 + $0x310] sm:$0xff] }
  0x93   :  { %591 = vmatpush.msra.mxu1 %v443_v22 }
  0x94   :  { %659 = vmatpush.msrb.mxu2 %v447_v39  ;;  %636 = vmatpush.msra.mxu0 %v399_v40 }
  0x95   :  { %592 = vmatpush.msra.mxu1 %v440_v26  ;;  %v471_v26 = vld [vmem:[#allocation2 + $0x358] sm:$0xff] }
  0x96   :  { %660 = vmatpush.msrb.mxu2 %v444_v43  ;;  %637 = vmatpush.msra.mxu0 %v396_v44 }
  0x97   :  { %593 = vmatpush.msra.mxu1 %v437_v30  ;;  %v1608_v12 = vpop.f32.mrf.mxu2 }
  0x98   :  { %661 = vmatpush.msrb.mxu2 %v441_v46  ;;  %638 = vmatpush.msra.mxu0 %v393_v50 }
  0x99   :  { %594 = vmatpush.msra.mxu1 %v434_v34  ;;  %v465_v34 = vld [vmem:[#allocation2 + $0x328] sm:$0xff] }
  0x9a   :  { %662 = vmatpush.msrb.mxu2 %v438_v47  ;;  %639 = vmatpush.msra.mxu0 %v390_v54 }
  0x9b   :  { %595 = vmatpush.msra.mxu1 %v431_v38 }
  0x9c   :  { %663 = vmatpush.msrb.mxu2 %v435_v48  ;;  %640 = vmatpush.msra.mxu0 %v387_v58 }
  0x9d   :  { %596 = vmatpush.msra.mxu1 %v428_v42 }
  0x9e   :  { %664 = vmatpush.msrb.mxu2 %v432_v51  ;;  %641 = vmatpush.msra.mxu0 %v384_v62  ;;  %v1644_v38 = vpop.f32.mrf.mxu3 }
  0x9f   :  { %597 = vmatpush.msra.mxu1 %v425_v49  ;;  %v1617_v16 = vpop.f32.mrf.mxu2 }
  0xa0   :  { %665 = vmatpush.msrb.mxu2 %v429_v55  ;;  %642 = vmatpush.msra.mxu0 %v381_v2 }
  0xa1   :  { %598 = vmatpush.msra.mxu1 %v422_v53 }
  0xa2   :  { %666 = vmatpush.msrb.mxu2 %v426_v59  ;;  %643 = vmatpush.msra.mxu0 %v378_v5 }
  0xa3   :  { %599 = vmatpush.msra.mxu1 %v419_v57 }
  0xa4   :  { %667 = vmatpush.msrb.mxu2 %v423_v63  ;;  %644 = vmatpush.msra.mxu0 %v375_v7 }
  0xa5   :  { %600 = vmatpush.msra.mxu1 %v416_v61 }
  0xa6   :  { %668 = vmatpush.msrb.mxu2 %v420_v3  ;;  %645 = vmatpush.msra.mxu0 %v372_v9 }
  0xa7   :  { %601 = vmatpush.msra.mxu1 %v413_v1 }
  0xa8   :  { %669 = vmatpush.msrb.mxu2 %v417_v6  ;;  %646 = vmatpush.msra.mxu0 %v369_v10 }
  0xaa   :  { %670 = vmatpush.msrb.mxu2 %v414_v8  ;;  %647 = vmatpush.msra.mxu0 %v366_v11 }
 0x105   :  { %v312_v19 = vpop.f32.mrf.mxu0  ;;  %v335_v20 = vpop.f32.mrf.mxu1 }
 0x106   :  { %v1619_v21 = vadd.f32 %v312_v19, %v273_v17  ;;  %v1621_v22 = vadd.f32 %v335_v20, %v274_v18 }
 0x108   :  { %510 = vmatmul.f32.vlgmr.msrb.gmra.mxu3 %v1619_v21  ;;  %533 = vmatmul.f32.vlgmr.msrb.gmra.mxu0 %v1621_v22 }
 0x109   :  { %579 = vmatmul.f32.vlgmr.msra.gmra.mxu2 %v1619_v21  ;;  %1333 = vmatpush.msk.msrb.mxu3 %vm120_vm0, %v477_v23 }
 0x10a   :  { %788 = vmatpush.xpose.msra.mxu2 %v1612_v14 }
 0x10b   :  { %689 = vmatpush.msrb.mxu3 %v474_v24 }
 0x10c   :  { %v358_v27 = vpop.f32.mrf.mxu2 }
 0x10d   :  { %v1628_v29 = vadd.f32 %v358_v27, %v275_v25  ;;  %v315_v30 = vpop.f32.mrf.mxu0  ;;  %v338_v31 = vpop.f32.mrf.mxu1  ;;  %690 = vmatpush.msrb.mxu3 %v471_v26 }
 0x10e   :  { %v1630_v32 = vadd.f32 %v315_v30, %v273_v17  ;;  %v1632_v33 = vadd.f32 %v338_v31, %v274_v18 }
 0x10f   :  { %1328 = vmatmul.msk.f32.vlgmr.msrb.gmra.mxu1 %vm478_vm4, %v1628_v29  ;;  %691 = vmatpush.msrb.mxu3 %v468_v28 }
 0x110   :  { %722 = vmatpush.xpose.msrb.mxu1 %v1606_v4  ;;  %513 = vmatmul.f32.gmra.mxu3 %v1630_v32 }
 0x111   :  { %536 = vmatmul.f32.gmra.mxu0 %v1632_v33  ;;  %582 = vmatmul.f32.gmra.mxu2 %v1630_v32 }
 0x112   :  { %692 = vmatpush.msrb.mxu3 %v465_v34 }
 0x114   :  { %v361_v36 = vpop.f32.mrf.mxu2  ;;  %693 = vmatpush.msrb.mxu3 %v462_v35 }
 0x115   :  { %v1640_v37 = vadd.f32 %v361_v36, %v275_v25 }
 0x117   :  { %1329 = vmatmul.msk.f32.gmra.mxu1 %vm478_vm4, %v1640_v37 }
 0x118   :  { %1331 = vmatmul.msk.f32.vlgmr.msra.gmra.mxu3 %vm478_vm4, %v1628_v29 }
 0x119   :  { %648 = vmatmul.f32.vlgmr.msra.gmra.mxu0 %v1619_v21  ;;  %671 = vmatmul.f32.vlgmr.msrb.gmra.mxu2 %v1621_v22 }
 0x11a   :  { %1336 = vmatpush.xpose.msk.msra.mxu3 %vm478_vm4, %v1610_v13  ;;  %1338 = vmatpush.xpose.msk.msrb.mxu2 %vm478_vm4, %v1644_v38 }
 0x11f   :  { %602 = vmatmul.f32.vlgmr.msra.gmra.mxu1 %v1621_v22 }
 0x120   :  { %742 = vmatpush.xpose.msra.mxu1 %v1608_v12  ;;  %1332 = vmatmul.msk.f32.gmra.mxu3 %vm478_vm4, %v1640_v37 }
 0x121   :  { %651 = vmatmul.f32.gmra.mxu0 %v1630_v32  ;;  %674 = vmatmul.f32.gmra.mxu2 %v1632_v33 }
 0x127   :  { %605 = vmatmul.f32.gmra.mxu1 %v1632_v33 }
 0x128   :  { %1334 = vmatmul.msk.f32.vlgmr.msrb.gmra.mxu3 %vm478_vm4, %v1628_v29 }
 0x130   :  { %1335 = vmatmul.msk.f32.gmra.mxu3 %vm478_vm4, %v1640_v37 }
 0x185   :  { %v534_v39 = vpop.f32.mrf.mxu0 }
 0x18b   :  { %v511_v40 = vpop.f32.mrf.mxu3 }
 0x18c   :  { %v535_v41 = vadd.f32 %v534_v39, %v511_v40  ;;  %v557_v42 = vpop.f32.mrf.mxu1  ;;  %v580_v44 = vpop.f32.mrf.mxu2 }
 0x18e   :  { %v558_v43 = vadd.f32 %v557_v42, %v535_v41  ;;  %v537_v45 = vpop.f32.mrf.mxu0 }
 0x190   :  { %723 = vmatmul.f32.vlgmr.msrb.gmra.mxu1 %v558_v43 }
 0x191   :  { %808 = vmatpush.xpose.msrb.mxu1 %v1617_v16 }
 0x193   :  { %v514_v46 = vpop.f32.mrf.mxu3 }
 0x194   :  { %v538_v47 = vadd.f32 %v537_v45, %v514_v46  ;;  %v560_v48 = vpop.f32.mrf.mxu1  ;;  %v583_v50 = vpop.f32.mrf.mxu2 }
 0x196   :  { %v561_v49 = vadd.f32 %v560_v48, %v538_v47  ;;  %v649_v59 = vpop.f32.mrf.mxu0 }
 0x198   :  { %789 = vmatmul.f32.vlgmr.msra.gmra.mxu2 %v561_v49 }
 0x19b   :  { %v626_v51 = vpop.f32.mrf.mxu3 }
 0x19c   :  { %v603_v52 = vpop.f32.mrf.mxu1  ;;  %v672_v57 = vpop.f32.mrf.mxu2 }
 0x19d   :  { %v604_v53 = vadd.f32 %v603_v52, %v580_v44  ;;  %v673_v61 = vadd.f32 %v672_v57, %v649_v59 }
 0x19e   :  { %v652_v1 = vpop.f32.mrf.mxu0 }
 0x19f   :  { %v627_v54 = vadd.f32 %v626_v51, %v604_v53 }
 0x1a1   :  { %743 = vmatmul.f32.vlgmr.msra.gmra.mxu1 %v627_v54 }
 0x1a3   :  { %v629_v55 = vpop.f32.mrf.mxu3 }
 0x1a4   :  { %v606_v56 = vpop.f32.mrf.mxu1  ;;  %v675_v0 = vpop.f32.mrf.mxu2 }
 0x1a5   :  { %v607_v58 = vadd.f32 %v606_v56, %v583_v50  ;;  %v676_v2 = vadd.f32 %v675_v0, %v652_v1 }
 0x1a7   :  { %v630_v60 = vadd.f32 %v629_v55, %v607_v58  ;;  %v860_v55 = vlaneseq }
 0x1a9   :  { %809 = vmatmul.f32.vlgmr.msrb.gmra.mxu1 %v630_v60  ;;  %v1677_v60 = vand.u32 127, %v860_v55 }
 0x1ab   :  { %v695_v62 = vpop.f32.mrf.mxu3 }
 0x1ac   :  { %v696_v63 = vadd.f32 %v695_v62, %v673_v61 }
 0x1ae   :  { %1337 = vmatmul.msk.f32.vlgmr.msra.gmra.mxu3 %vm478_vm4, %v696_v63 }
 0x1b3   :  { %v698_v3 = vpop.f32.mrf.mxu3 }
 0x1b4   :  { %v699_v5 = vadd.f32 %v698_v3, %v676_v2 }
 0x1b6   :  { %1339 = vmatmul.msk.f32.vlgmr.msrb.gmra.mxu2 %vm478_vm4, %v699_v5  ;;  %v1687_v5 = vshrl.u32 %v860_v55, 7 }
 0x1b8   :  { %1349 = vset.pattern.permute.xlu2 %v1687_v5 }
 0x20d   :  { %v724_v6 = vpop.f32.mrf.mxu1 }
 0x21b   :  { %v790_v9 = vpop.f32.mrf.mxu2 }
 0x21e   :  { %v744_v7 = vpop.f32.mrf.mxu1 }
 0x21f   :  { %v745_v8 = vadd.f32 %v744_v7, %v724_v6  ;;  %v1432_v6 = vmov 0  }
 0x220   :  { %1350 = vset.pattern.permute.xlu1 %v1432_v6  ;;  %1352 = vset.pattern.permute.xlu0 %v1432_v6 }
 0x226   :  { %v810_v15 = vpop.f32.mrf.mxu1 }
 0x227   :  { %v811_v17 = vadd.f32 %v810_v15, %v790_v9  ;;  %v1128_v15 = vld [vmem:[%s1876_s7 + $0x70] sm:$0xff] }
 0x231   :  { %v764_v10 = vpop.f32.mrf.mxu3 }
 0x232   :  { %v765_v11 = vadd.f32 %v764_v10, %v745_v8  ;;  %v1129_v10 = vld [vmem:[%s1876_s7 + $0x78] sm:$0xff] }
 0x233   :  { %1168 = vmatpush.msrb.mxu3 %v1129_v10  ;;  %v1120_v10 = vld [vmem:[%s1876_s7 + $0x30] sm:$0xff] }
 0x234   :  { %1357 = vtanh.f32 %v765_v11  ;;  %v1145_v11 = vld [vmem:[%s1876_s7 + $0xf8] sm:$0xff] }
 0x235   :  { %1188 = vmatpush.msrb.mxu0 %v1145_v11  ;;  %1169 = vmatpush.msrb.mxu3 %v1128_v15  ;;  %v1136_v11 = vld [vmem:[%s1876_s7 + $0xb0] sm:$0xff]  ;;  %v1119_v15 = vld [vmem:[%s1876_s7 + $0x28] sm:$0xff] }
 0x239   :  { %v830_v18 = vpop.f32.mrf.mxu2 }
 0x23a   :  { %v1358_v19 = vpop.eup %1357  ;;  %v831_v20 = vadd.f32 %v830_v18, %v811_v17 }
 0x23b   :  { %v836_v23 = vsel %vm835_vm5, %v1358_v19, -inf  ;;  %v1144_v19 = vld [vmem:[%s1876_s7 + $0xf0] sm:$0xff] }
 0x23c   :  { %1359 = vtanh.f32 %v831_v20  ;;  %837 = vmax.xlane.f32.xlu1 %v836_v23  ;;  %v842_v24 = vrot.slane %v836_v23, 4  ;;  %1189 = vmatpush.msrb.mxu0 %v1144_v19  ;;  %v1118_v19 = vld [vmem:[%s1876_s7 + $0x20] sm:$0xff] }
 0x23e   :  { %v843_v25 = vmax.f32 %v836_v23, %v842_v24  ;;  %v1127_v24 = vld [vmem:[%s1876_s7 + $0x68] sm:$0xff] }
 0x23f   :  { %1170 = vmatpush.msrb.mxu3 %v1127_v24  ;;  %v1117_v24 = vld [vmem:[%s1876_s7 + $0x18] sm:$0xff] }
 0x240   :  { %v844_v26 = vrot.slane %v843_v25, 2 }
 0x242   :  { %v1360_v27 = vpop.eup %1359  ;;  %v845_v28 = vmax.f32 %v843_v25, %v844_v26  ;;  %v1143_v25 = vld [vmem:[%s1876_s7 + $0xe8] sm:$0xff] }
 0x243   :  { %v839_v30 = vsel %vm835_vm5, %v1360_v27, -inf  ;;  %1190 = vmatpush.msrb.mxu0 %v1143_v25  ;;  %v1133_v25 = vld [vmem:[%s1876_s7 + $0x98] sm:$0xff] }
 0x244   :  { %840 = vmax.xlane.f32.xlu1 %v839_v30  ;;  %v848_v31 = vrot.slane %v839_v30, 4  ;;  %v846_v35 = vrot.slane %v845_v28, 1 }
 0x246   :  { %v849_v34 = vmax.f32 %v839_v30, %v848_v31  ;;  %v847_v40 = vmax.f32 %v845_v28, %v846_v35  ;;  %v1142_v35 = vld [vmem:[%s1876_s7 + $0xe0] sm:$0xff] }
 0x247   :  { %1191 = vmatpush.msrb.mxu0 %v1142_v35  ;;  %v1147_v35 = vld [vmem:[%s1876_s7 + $0x108] sm:$0xff] }
 0x248   :  { %v850_v36 = vrot.slane %v849_v34, 2  ;;  %vm932_vm6 = vcmp.eq.f32.partialorder %v847_v40, 0.0 }
 0x249   :  { %v934_v43 = vsel %vm932_vm6, -1e+09, %v847_v40 }
 0x24a   :  { %v851_v39 = vmax.f32 %v849_v34, %v850_v36  ;;  %v1126_v34 = vld [vmem:[%s1876_s7 + $0x60] sm:$0xff] }
 0x24b   :  { %1171 = vmatpush.msrb.mxu3 %v1126_v34  ;;  %v1131_v34 = vld [vmem:[%s1876_s7 + $0x88] sm:$0xff] }
 0x24c   :  { %v852_v41 = vrot.slane %v851_v39, 1 }
 0x24e   :  { %v853_v42 = vmax.f32 %v851_v39, %v852_v41 }
 0x250   :  { %vm933_vm8 = vcmp.eq.f32.partialorder %v853_v42, 0.0 }
 0x251   :  { %v935_v44 = vsel %vm933_vm8, -1e+09, %v853_v42  ;;  %vm1070_vm8 = vcmask 1045504  }
 0x252   :  { %v938_v45 = vsel %vm864_vm7, %v935_v44, %v934_v43 }
 0x253   :  { %v941_v46 = vsel %vm940_vm9, %v938_v45, -inf }
 0x254   :  { %942 = vmax.xlane.f32.xlu0 %v941_v46 }
 0x2af   :  { %v838_v47 = vpop.xlane.xlu1 %837 }
 0x2b0   :  { %vm854_vm11 = vcmp.eq.f32.partialorder %v838_v47, 0.0 }
 0x2b1   :  { %v856_v62 = vsel %vm854_vm11, -1e+09, %v838_v47 }
 0x2b2   :  { %v862_v1 = vperm.slane %v856_v62, %v1677_v60 }
 0x2b7   :  { %v841_v54 = vpop.xlane.xlu1 %840 }
 0x2b8   :  { %vm855_vm10 = vcmp.eq.f32.partialorder %v841_v54, 0.0 }
 0x2b9   :  { %v1675_v59 = vsel %vm855_vm10, -1e+09, %v841_v54 }
 0x2ba   :  { %v863_v0 = vperm.slane %v1675_v59, %v1677_v60 }
 0x2bc   :  { %v865_v2 = vsel %vm864_vm7, %v863_v0, %v862_v1  ;;  %v1125_v0 = vld [vmem:[%s1876_s7 + $0x58] sm:$0xff]  ;;  %v1140_v1 = vld [vmem:[%s1876_s7 + $0xd0] sm:$0xff] }
 0x2bd   :  { %v868_v3 = vsel %vm867_vm12, %v865_v2, -inf  ;;  %1172 = vmatpush.msrb.mxu3 %v1125_v0  ;;  %v1123_v2 = vld [vmem:[%s1876_s7 + $0x48] sm:$0xff] }
 0x2c7   :  { %v943_v48 = vpop.xlane.xlu0 %942 }
 0x2c8   :  { %v945_v49 = vrot.slane %v943_v48, 1  ;;  %v948_v50 = vsub.f32 %v934_v43, %v943_v48 }
 0x2ca   :  { %v949_v51 = vsub.f32 %v935_v44, %v945_v49  ;;  %v950_v52 = vmul.f32 1.442695, %v948_v50 }
 0x2cc   :  { %v952_v53 = vmul.f32 1.442695, %v949_v51 }
 0x2ce   :  { %1361 = vpow2.f32 %v952_v53 }
 0x2cf   :  { %1363 = vpow2.f32 %v950_v52 }
 0x2d4   :  { %v1670_v56 = vpop.eup %1361 }
 0x2d5   :  { %v956_v57 = vrot.slane %v1670_v56, 7  ;;  %v1673_v58 = vpop.eup %1363 }
 0x2d7   :  { %v957_v61 = vsel %vm864_vm7, %v956_v57, %v1673_v58 }
 0x2d8   :  { %v959_v63 = vsel %vm940_vm9, %v957_v61, 0.0  ;;  %vm1085_vm9 = vcmask 357376  }
 0x2d9   :  { %960 = vadd.xlane.f32.xlu0 %v959_v63 }
 0x2e1   :  { %869 = vmax.xlane.f32.xlu0 %v868_v3  ;;  %v1139_v3 = vld [vmem:[%s1876_s7 + $0xc8] sm:$0xff] }
 0x34c   :  { %v961_v7 = vpop.xlane.xlu0 %960 }
 0x34d   :  { %v963_v8 = vrot.slane %v961_v7, 1  ;;  %1365 = vrcp.f32 %v961_v7  ;;  %v975_v30 = vand.u32 2147483647, %v961_v7  ;;  %v977_v31 = vand.u32 2147483648, %v961_v7 }
 0x34e   :  { %vm971_vm14 = vweird.f32 %v961_v7 }
 0x34f   :  { %1367 = vrcp.f32 %v963_v8  ;;  %vm976_vm2 = vcmp.eq.f32.partialorder %v975_v30, 8.507059e+37  ;;  %v978_v43 = vor.u32 1.1754944e-38, %v977_v31  ;;  %v992_v44 = vand.u32 2147483648, %v963_v8  ;;  %v1148_v30 = vld [vmem:[%s1876_s7 + $0x110] sm:$0xff]  ;;  %v1115_v31 = vld [vmem:[%s1876_s7 + $0x8] sm:$0xff] }
 0x350   :  { %vm986_vm3 = vweird.f32 %v963_v8  ;;  %v990_v47 = vand.u32 2147483647, %v963_v8 }
 0x351   :  { %v993_v51 = vor.u32 1.1754944e-38, %v992_v44 }
 0x352   :  { %vm991_vm6 = vcmp.eq.f32.partialorder %v990_v47, 8.507059e+37 }
 0x353   :  { %v1366_v9 = vpop.eup %1365 }
 0x354   :  { %v967_v17 = vmul.f32 %v1366_v9, %v961_v7  ;;  %v870_v18 = vpop.xlane.xlu0 %869  ;;  %vm972_vm13 = vweird.f32 %v1366_v9  ;;  %v1138_v7 = vld [vmem:[%s1876_s7 + $0xc0] sm:$0xff] }
 0x355   :  { %v1368_v20 = vpop.eup %1367  ;;  %v872_v23 = vperm.slane %v870_v18, 0  ;;  %vm973_vm1 = vmor %vm971_vm14, %vm972_vm13  ;;  %v873_v52 = vperm.slane %v870_v18, 1  ;;  %v1151_v18 = vld [vmem:[%s1876_s7 + $0x128] sm:$0xf] }
 0x356   :  { %v968_v26 = vsub.f32 1.0, %v967_v17  ;;  %v982_v27 = vmul.f32 %v1368_v20, %v963_v8  ;;  %vm987_vm15 = vweird.f32 %v1368_v20  ;;  %v1121_v8 = vld [vmem:[%s1876_s7 + $0x38] sm:$0xff]  ;;  %v1135_v17 = vld [vmem:[%s1876_s7 + $0xa8] sm:$0xff]  ;;  %1340 = vmatpush.msk.msra.mxu1 %vm120_vm0, %v1151_v18 }
 0x357   :  { %v876_v28 = vsub.f32 %v856_v62, %v872_v23  ;;  %vm988_vm5 = vmor %vm986_vm3, %vm987_vm15  ;;  %v877_v57 = vsub.f32 %v1675_v59, %v873_v52  ;;  %v1124_v59 = vld [vmem:[%s1876_s7 + $0x50] sm:$0xff]  ;;  %v1150_v23 = vld [vmem:[%s1876_s7 + $0x120] sm:$0xff]  ;;  %vm1279_vm3 = vcmask 1043458  }
 0x358   :  { %v969_v36 = vmul.f32 %v1366_v9, %v968_v26  ;;  %v983_v39 = vsub.f32 1.0, %v982_v27  ;;  %1173 = vmatpush.msrb.mxu3 %v1124_v59  ;;  %1219 = vmatpush.msra.mxu1 %v1150_v23  ;;  %v1149_v26 = vld [vmem:[%s1876_s7 + $0x118] sm:$0xff]  ;;  %v1116_v27 = vld [vmem:[%s1876_s7 + $0x10] sm:$0xff] }
 0x359   :  { %v878_v40 = vmul.f32 1.442695, %v876_v28  ;;  %v880_v62 = vmul.f32 1.442695, %v877_v57  ;;  %v1132_v28 = vld [vmem:[%s1876_s7 + $0x90] sm:$0xff] }
 0x35a   :  { %v970_v41 = vadd.f32 %v1366_v9, %v969_v36  ;;  %v984_v42 = vmul.f32 %v1368_v20, %v983_v39  ;;  %1174 = vmatpush.msrb.mxu3 %v1123_v2  ;;  %1220 = vmatpush.msra.mxu1 %v1149_v26  ;;  %v1114_v36 = vld [vmem:[%s1876_s7] sm:$0xff] }
 0x35b   :  { %1369 = vpow2.f32 %v878_v40  ;;  %v1130_v39 = vld [vmem:[%s1876_s7 + $0x80] sm:$0xff] }
 0x35c   :  { %v974_v45 = vsel %vm973_vm1, %v1366_v9, %v970_v41  ;;  %v985_v46 = vadd.f32 %v1368_v20, %v984_v42  ;;  %1371 = vpow2.f32 %v880_v62  ;;  %v1137_v9 = vld [vmem:[%s1876_s7 + $0xb8] sm:$0xff]  ;;  %1221 = vmatpush.msra.mxu1 %v1148_v30  ;;  %v1146_v40 = vld [vmem:[%s1876_s7 + $0x100] sm:$0xff] }
 0x35d   :  { %v979_v48 = vsel %vm976_vm2, %v978_v43, %v974_v45  ;;  %vm1272_vm2 = vcmask 1041408  }
 0x35e   :  { %v980_v49 = vmul.f32 %v1673_v58, %v979_v48  ;;  %v989_v50 = vsel %vm988_vm5, %v1368_v20, %v985_v46  ;;  %v1134_v20 = vld [vmem:[%s1876_s7 + $0xa0] sm:$0xff]  ;;  %1222 = vmatpush.msra.mxu1 %v1147_v35  ;;  %vm1280_vm5 = vmor %vm1279_vm3, %vm1272_vm2 }
 0x35f   :  { %v994_v55 = vsel %vm991_vm6, %v993_v51, %v989_v50  ;;  %vm1281_vm6 = vcmask 357380  }
 0x360   :  { %v1050_v53 = vperm.slane %v980_v49, 0  ;;  %v995_v61 = vmul.f32 %v1670_v56, %v994_v55  ;;  %v1141_v56 = vld [vmem:[%s1876_s7 + $0xd8] sm:$0xff]  ;;  %1223 = vmatpush.msra.mxu1 %v1146_v40 }
 0x361   :  { %v1717_v54 = vpop.eup %1369  ;;  %1192 = vmatpush.msrb.mxu0 %v1141_v56 }
 0x362   :  { %1055 = vperm.xlu2 %1349, %v1050_v53   ;;  %885 = vperm.xlu1 %1350, %v1717_v54   ;;  %v1057_v63 = vperm.slane %v995_v61, 0  ;;  %v1723_v58 = vpop.eup %1371 }
 0x363   :  { %1193 = vmatpush.msrb.mxu0 %v1140_v1 }
 0x365   :  { %1194 = vmatpush.msrb.mxu0 %v1139_v3 }
 0x367   :  { %1195 = vmatpush.msrb.mxu0 %v1138_v7 }
 0x369   :  { %1196 = vmatpush.msrb.mxu0 %v1137_v9 }
 0x36a   :  { %1062 = vperm.xlu2 %1349, %v1057_v63   ;;  %1354 = vset.pattern.permute.xlu1 %v1687_v5 }
 0x36b   :  { %1197 = vmatpush.msrb.mxu0 %v1136_v11 }
 0x36d   :  { %1198 = vmatpush.msrb.mxu0 %v1135_v17 }
 0x36f   :  { %1199 = vmatpush.msrb.mxu0 %v1134_v20 }
 0x371   :  { %1200 = vmatpush.msrb.mxu0 %v1133_v25 }
 0x372   :  { %1351 = vset.pattern.permute.xlu2 %v1432_v6  ;;  %v1122_v6 = vld [vmem:[%s1876_s7 + $0x40] sm:$0xff] }
 0x373   :  { %888 = vperm.xlu2 %1351, %v1723_v58   ;;  %1175 = vmatpush.msrb.mxu3 %v1122_v6 }
 0x374   :  { %1201 = vmatpush.msrb.mxu0 %v1132_v28 }
 0x375   :  { %1176 = vmatpush.msrb.mxu3 %v1121_v8 }
 0x376   :  { %1202 = vmatpush.msrb.mxu0 %v1131_v34 }
 0x377   :  { %1177 = vmatpush.msrb.mxu3 %v1120_v10 }
 0x378   :  { %1203 = vmatpush.msrb.mxu0 %v1130_v39 }
 0x379   :  { %1178 = vmatpush.msrb.mxu3 %v1119_v15 }
 0x37b   :  { %1179 = vmatpush.msrb.mxu3 %v1118_v19 }
 0x37d   :  { %1180 = vmatpush.msrb.mxu3 %v1117_v24 }
 0x37f   :  { %1181 = vmatpush.msrb.mxu3 %v1116_v27 }
 0x381   :  { %1182 = vmatpush.msrb.mxu3 %v1115_v31 }
 0x383   :  { %1183 = vmatpush.msrb.mxu3 %v1114_v36 }
 0x3bc   :  { %v1056_v41 = vpop.permute.xlu2 %1055 }
 0x3bd   :  { %v1064_v42 = vmul.f32 %v1056_v41, %v1606_v4  ;;  %v1065_v43 = vmul.f32 %v1056_v41, %v1608_v12  ;;  %v1066_v44 = vmul.f32 %v1056_v41, %v1610_v13 }
 0x3bf   :  { %v1071_v45 = vsel %vm1070_vm8, %v1064_v42, 0.0  ;;  %v1078_v46 = vsel %vm1070_vm8, %v1065_v43, 0.0  ;;  %v1086_v47 = vsel %vm1085_vm9, %v1066_v44, 0.0 }
 0x3c0   :  { %v1072_v48 = vrot.slane %v1071_v45, 4  ;;  %v1079_v49 = vrot.slane %v1078_v46, 4  ;;  %v1087_v50 = vrot.slane %v1086_v47, 4 }
 0x3c2   :  { %v1073_v51 = vadd.f32 %v1072_v48, %v1071_v45  ;;  %v1080_v52 = vadd.f32 %v1079_v49, %v1078_v46  ;;  %v1088_v53 = vadd.f32 %v1087_v50, %v1086_v47  ;;  %v1356_v46 = vld [vmem:[%s1877_s8] ss:$0 sm:$0xff]  ;;  %s1433_s8 = smov [#allocation5]  }
 0x3c3   :  { %1254 = vperm.xlu1 %1354, %v1356_v46   ;;  %s1289_s6 = sshll.u32 %s1433_s8, 4  ;;  %s1290_s6 = int_to_ptr.vmem [resolvable:$true] %s1289_s6 }
 0x3c4   :  { %v1074_v55 = vrot.slane %v1073_v51, 2  ;;  %v1063_v57 = vpop.permute.xlu2 %1062  ;;  %v1089_v61 = vrot.slane %v1088_v53, 2  ;;  %v1081_v62 = vrot.slane %v1080_v52, 2 }
 0x3c5   :  { %v1067_v4 = vmul.f32 %v1063_v57, %v1612_v14  ;;  %v1068_v12 = vmul.f32 %v1063_v57, %v1617_v16  ;;  %v1069_v13 = vmul.f32 %v1063_v57, %v1644_v38 }
 0x3c6   :  { %v1075_v3 = vadd.f32 %v1074_v55, %v1073_v51  ;;  %v1090_v6 = vadd.f32 %v1089_v61, %v1088_v53  ;;  %v1082_v7 = vadd.f32 %v1081_v62, %v1080_v52 }
 0x3c7   :  { %v1093_v63 = vsel %vm1070_vm8, %v1067_v4, 0.0  ;;  %v1100_v0 = vsel %vm1070_vm8, %v1068_v12, 0.0  ;;  %v1107_v56 = vsel %vm1085_vm9, %v1069_v13, 0.0  ;;  %vm1850_vm8 = vmor %vm1281_vm6, %vm1280_vm5 }
 0x3c8   :  { %v1094_v59 = vrot.slane %v1093_v63, 4  ;;  %v1101_v1 = vrot.slane %v1100_v0, 4  ;;  %v1108_v2 = vrot.slane %v1107_v56, 4  ;;  %v1091_v38 = vrot.slane %v1090_v6, 1 }
 0x3c9   :  { %v1076_v15 = vrot.slane %v1075_v3, 1  ;;  %v1083_v20 = vrot.slane %v1082_v7, 1 }
 0x3ca   :  { %v1095_v8 = vadd.f32 %v1094_v59, %v1093_v63  ;;  %v1102_v9 = vadd.f32 %v1101_v1, %v1100_v0  ;;  %v1109_v14 = vadd.f32 %v1108_v2, %v1107_v56  ;;  %v1092_v27 = vadd.f32 %v1091_v38, %v1090_v6 }
 0x3cb   :  { %v1077_v26 = vadd.f32 %v1076_v15, %v1075_v3  ;;  %v1084_v31 = vadd.f32 %v1083_v20, %v1082_v7 }
 0x3cc   :  { %v1096_v10 = vrot.slane %v1095_v8, 2  ;;  %v1103_v16 = vrot.slane %v1102_v9, 2  ;;  %v1110_v11 = vrot.slane %v1109_v14, 2 }
 0x3cd   :  { %v889_v28 = vpop.permute.xlu2 %888 }
 0x3ce   :  { %v1097_v17 = vadd.f32 %v1096_v10, %v1095_v8  ;;  %v1104_v18 = vadd.f32 %v1103_v16, %v1102_v9  ;;  %v1111_v19 = vadd.f32 %v1110_v11, %v1109_v14  ;;  %v891_v42 = vperm.slane %v889_v28, %v1677_v60 }
 0x3d0   :  { %v1112_v23 = vrot.slane %v1111_v19, 1  ;;  %v1098_v24 = vrot.slane %v1097_v17, 1  ;;  %v1105_v25 = vrot.slane %v1104_v18, 1 }
 0x3d2   :  { %v1099_v30 = vadd.f32 %v1098_v24, %v1097_v17  ;;  %v1106_v34 = vadd.f32 %v1105_v25, %v1104_v18  ;;  %v1113_v35 = vadd.f32 %v1112_v23, %v1111_v19 }
 0x3d4   :  { %v886_v36 = vpop.permute.xlu1 %885  ;;  %v1158_v39 = vsel %vm864_vm7, %v1099_v30, %v1077_v26  ;;  %v1159_v40 = vsel %vm864_vm7, %v1106_v34, %v1084_v31  ;;  %v1160_v41 = vsel %vm864_vm7, %v1113_v35, %v1092_v27 }
 0x3d5   :  { %v890_v43 = vperm.slane %v886_v36, %v1677_v60  ;;  %1184 = vmatmul.f32.vlgmr.msrb.gmra.mxu3 %v1158_v39  ;;  %1204 = vmatmul.f32.vlgmr.msrb.gmra.mxu0 %v1159_v40 }
 0x3d6   :  { %1341 = vmatmul.msk.f32.vlgmr.msra.gmra.mxu1 %vm478_vm4, %v1160_v41 }
 0x3d7   :  { %v892_v44 = vsel %vm864_vm7, %v891_v42, %v890_v43 }
 0x3d8   :  { %v894_v45 = vsel %vm867_vm12, %v892_v44, 0.0 }
 0x3d9   :  { %895 = vadd.xlane.f32.xlu0 %v894_v45 }
 0x435   :  { %v1255_v42 = vpop.permute.xlu1 %1254 }
 0x44c   :  { %v896_v47 = vpop.xlane.xlu0 %895 }
 0x44d   :  { %v898_v48 = vperm.slane %v896_v47, 0  ;;  %v899_v49 = vperm.slane %v896_v47, 1 }
 0x44f   :  { %1373 = vrcp.f32 %v898_v48  ;;  %v913_v57 = vand.u32 2147483648, %v898_v48  ;;  %v928_v61 = vand.u32 2147483648, %v899_v49  ;;  %v911_v12 = vand.u32 2147483647, %v898_v48 }
 0x450   :  { %1375 = vrcp.f32 %v899_v49  ;;  %v926_v62 = vand.u32 2147483647, %v899_v49  ;;  %vm907_vm11 = vweird.f32 %v898_v48  ;;  %vm922_vm12 = vweird.f32 %v899_v49 }
 0x451   :  { %v914_v56 = vor.u32 1.1754944e-38, %v913_v57  ;;  %v929_v59 = vor.u32 1.1754944e-38, %v928_v61  ;;  %vm912_vm15 = vcmp.eq.f32.partialorder %v911_v12, 8.507059e+37 }
 0x452   :  { %vm927_vm1 = vcmp.eq.f32.partialorder %v926_v62, 8.507059e+37  ;;  %v1205_v14 = vpop.f32.mrf.mxu0 }
 0x453   :  { %v1225_v16 = vpop.f32.mrf.mxu1 }
 0x455   :  { %v1374_v60 = vpop.eup %1373 }
 0x456   :  { %v1376_v50 = vpop.eup %1375  ;;  %v903_v51 = vmul.f32 %v1374_v60, %v898_v48  ;;  %vm908_vm7 = vweird.f32 %v1374_v60 }
 0x457   :  { %v918_v52 = vmul.f32 %v1376_v50, %v899_v49  ;;  %vm923_vm10 = vweird.f32 %v1376_v50  ;;  %vm909_vm13 = vmor %vm907_vm11, %vm908_vm7 }
 0x458   :  { %v904_v53 = vsub.f32 1.0, %v903_v51  ;;  %vm924_vm14 = vmor %vm922_vm12, %vm923_vm10  ;;  %v1185_v9 = vpop.f32.mrf.mxu3 }
 0x459   :  { %v919_v55 = vsub.f32 1.0, %v918_v52  ;;  %v1206_v10 = vadd.f32 %v1205_v14, %v1185_v9 }
 0x45a   :  { %v905_v4 = vmul.f32 %v1374_v60, %v904_v53 }
 0x45b   :  { %v920_v13 = vmul.f32 %v1376_v50, %v919_v55  ;;  %v1226_v11 = vadd.f32 %v1225_v16, %v1206_v10 }
 0x45c   :  { %v906_v63 = vadd.f32 %v1374_v60, %v905_v4 }
 0x45d   :  { %v921_v0 = vadd.f32 %v1376_v50, %v920_v13  ;;  %v1228_v38 = vperm.slane %v1226_v11, 0  ;;  %v1235_v15 = vperm.slane %v1226_v11, 1 }
 0x45e   :  { %v910_v1 = vsel %vm909_vm13, %v1374_v60, %v906_v63 }
 0x45f   :  { %v925_v2 = vsel %vm924_vm14, %v1376_v50, %v921_v0  ;;  %v915_v3 = vsel %vm912_vm15, %v914_v56, %v910_v1 }
 0x460   :  { %v930_v6 = vsel %vm927_vm1, %v929_v59, %v925_v2  ;;  %v916_v7 = vmul.f32 %v1717_v54, %v915_v3 }
 0x461   :  { %v931_v8 = vmul.f32 %v1723_v58, %v930_v6 }
 0x462   :  { %998 = vperm.xlu2 %1351, %v916_v7  }
 0x463   :  { %1003 = vperm.xlu0 %1352, %v931_v8  }
 0x46a   :  { %1353 = vset.pattern.permute.xlu2 %v1687_v5 }
 0x46b   :  { %1355 = vset.pattern.permute.xlu0 %v1687_v5 }
 0x472   :  { %1233 = vperm.xlu2 %1353, %v1228_v38  }
 0x47a   :  { %1240 = vperm.xlu2 %1353, %v1235_v15  }
 0x4bc   :  { %v999_v17 = vpop.permute.xlu2 %998 }
 0x4bd   :  { %v1006_v54 = vmul.f32 %v999_v17, %v1619_v21  ;;  %v1007_v58 = vmul.f32 %v999_v17, %v1621_v22  ;;  %v1008_v18 = vmul.f32 %v999_v17, %v1628_v29 }
 0x4bf   :  { %v1012_v19 = vrot.slane %v1006_v54, 4  ;;  %v1018_v20 = vrot.slane %v1007_v58, 4  ;;  %v1024_v23 = vsel %vm478_vm4, %v1008_v18, 0.0 }
 0x4c0   :  { %v1025_v24 = vrot.slane %v1024_v23, 4 }
 0x4c1   :  { %v1013_v25 = vadd.f32 %v1012_v19, %v1006_v54  ;;  %v1019_v26 = vadd.f32 %v1018_v20, %v1007_v58 }
 0x4c2   :  { %v1026_v5 = vadd.f32 %v1025_v24, %v1024_v23 }
 0x4c3   :  { %v1014_v27 = vrot.slane %v1013_v25, 2  ;;  %v1020_v28 = vrot.slane %v1019_v26, 2 }
 0x4c4   :  { %v1027_v30 = vrot.slane %v1026_v5, 2 }
 0x4c5   :  { %v1015_v31 = vadd.f32 %v1014_v27, %v1013_v25  ;;  %v1021_v34 = vadd.f32 %v1020_v28, %v1019_v26 }
 0x4c6   :  { %v1028_v35 = vadd.f32 %v1027_v30, %v1026_v5 }
 0x4c7   :  { %v1016_v36 = vrot.slane %v1015_v31, 1  ;;  %v1022_v21 = vrot.slane %v1021_v34, 1 }
 0x4c8   :  { %v1029_v39 = vrot.slane %v1028_v35, 1 }
 0x4c9   :  { %v1017_v40 = vadd.f32 %v1016_v36, %v1015_v31  ;;  %v1023_v29 = vadd.f32 %v1022_v21, %v1021_v34 }
 0x4ca   :  { %v1030_v22 = vadd.f32 %v1029_v39, %v1028_v35 }
 0x4cc   :  { %v1234_v41 = vpop.permute.xlu2 %1233 }
 0x4cd   :  { %v1242_v43 = vmul.f32 %v1234_v41, %v1017_v40  ;;  %v1243_v44 = vmul.f32 %v1234_v41, %v1023_v29  ;;  %v1244_v45 = vmul.f32 %v1234_v41, %v1030_v22 }
 0x4cf   :  { %v1257_v46 = vadd.f32 %v1255_v42, %v1243_v44  ;;  %v1258_v47 = vadd.f32 %v1255_v42, %v1244_v45  ;;  %v1256_v48 = vadd.f32 %v1255_v42, %v1242_v43 }
 0x4d1   :  { %v1268_v49 = vrot.slane %v1257_v46, 6  ;;  %v1269_v60 = vrot.slane %v1258_v47, 4 }
 0x4d3   :  { %v1273_v51 = vsel %vm1272_vm2, %v1256_v48, %v1268_v49 }
 0x4d4   :  { %v1274_v52 = vsel %vm120_vm0, %v1273_v51, %v1269_v60  ;;  %v1241_v10 = vpop.permute.xlu2 %1240 }
 0x4d5   :  { %v1004_v53 = vpop.permute.xlu0 %1003  ;;  %1283 = vst.msk [vmem:[#allocation5] sm:$0x3f] %vm1850_vm8, %v1274_v52 }
 0x4d6   :  { %v1009_v55 = vmul.f32 %v1004_v53, %v1630_v32  ;;  %v1010_v57 = vmul.f32 %v1004_v53, %v1632_v33  ;;  %v1011_v61 = vmul.f32 %v1004_v53, %v1640_v37 }
 0x4d8   :  { %v1031_v4 = vrot.slane %v1009_v55, 4  ;;  %v1037_v12 = vrot.slane %v1010_v57, 4  ;;  %v1043_v13 = vsel %vm478_vm4, %v1011_v61, 0.0 }
 0x4d9   :  { %v1044_v62 = vrot.slane %v1043_v13, 4 }
 0x4da   :  { %v1032_v63 = vadd.f32 %v1031_v4, %v1009_v55  ;;  %v1038_v0 = vadd.f32 %v1037_v12, %v1010_v57 }
 0x4db   :  { %v1045_v56 = vadd.f32 %v1044_v62, %v1043_v13 }
 0x4dc   :  { %v1033_v59 = vrot.slane %v1032_v63, 2  ;;  %v1039_v1 = vrot.slane %v1038_v0, 2 }
 0x4dd   :  { %v1046_v2 = vrot.slane %v1045_v56, 2 }
 0x4de   :  { %v1034_v3 = vadd.f32 %v1033_v59, %v1032_v63  ;;  %v1040_v6 = vadd.f32 %v1039_v1, %v1038_v0 }
 0x4df   :  { %v1047_v7 = vadd.f32 %v1046_v2, %v1045_v56 }
 0x4e0   :  { %v1035_v8 = vrot.slane %v1034_v3, 1  ;;  %v1041_v32 = vrot.slane %v1040_v6, 1 }
 0x4e1   :  { %v1048_v9 = vrot.slane %v1047_v7, 1 }
 0x4e2   :  { %v1036_v33 = vadd.f32 %v1035_v8, %v1034_v3  ;;  %v1042_v14 = vadd.f32 %v1041_v32, %v1040_v6 }
 0x4e3   :  { %v1049_v37 = vadd.f32 %v1048_v9, %v1047_v7 }
 0x4e4   :  { %v1245_v16 = vmul.f32 %v1241_v10, %v1036_v33  ;;  %v1246_v11 = vmul.f32 %v1241_v10, %v1042_v14 }
 0x4e5   :  { %v1247_v38 = vmul.f32 %v1241_v10, %v1049_v37 }
 0x4e6   :  { %v1260_v15 = vadd.f32 %v1255_v42, %v1246_v11  ;;  %v1259_v54 = vadd.f32 %v1255_v42, %v1245_v16 }
 0x4e7   :  { %v1261_v17 = vadd.f32 %v1255_v42, %v1247_v38 }
 0x4e8   :  { %v1270_v58 = vrot.slane %v1260_v15, 6 }
 0x4e9   :  { %v1271_v18 = vrot.slane %v1261_v17, 4 }
 0x4ea   :  { %v1275_v19 = vsel %vm1272_vm2, %v1259_v54, %v1270_v58 }
 0x4eb   :  { %v1276_v20 = vsel %vm120_vm0, %v1275_v19, %v1271_v18 }
 0x4ec   :  { %1284 = vst.msk [vmem:[#allocation5 + $0x6] sm:$0x3f] %vm1850_vm8, %v1276_v20 }
 0x4ed   :  { %1297 = dma.vmem_to_hbm [thread:$0]  %s1290_s6, 192, %s1292_s2, [#allocation4], %s1434_s22, %s1434_s22, %s1435_s5  }
 0x4ee   :  { %1427 = dma.done.wait [#allocation4], 192  }
 0x4ef   :  { %1428 = vsyncadd [#allocation4], 4294967104 }
 0x4f0   :  { %1302 = vsyncpa [#allocation3], 1 }
 0x4f1   :  { %1303 = vsyncpa [#allocation4], 1 }

</bundles_post_ra>
